<compile_context>
chip_gen: v5e
topology: v5e:2x2
jax: 0.10.0
libtpu: 0.0.40
codegen_flags: <defaults>
</compile_context>

<pallas_src>
import functools

import jax
import jax.numpy as jnp
from jax.experimental import pallas as pl
from jax.experimental.pallas import tpu as pltpu


def _rup(n, m):
    return ((n + m - 1) // m) * m


def _double_conv_kernel(*refs, K, P, L, Lp, identity_res, compute_dtype):
    if identity_res:
        x_ref, w1_ref, b1_ref, w2_ref, b2_ref, o_ref, s1, s2 = refs
    else:
        (x_ref, w1_ref, b1_ref, w2_ref, b2_ref, wr_ref, br_ref, o_ref,
         s1, s2) = refs

    W = x_ref.shape[-1]          # bt * Lp lanes (multiple of 128)
    C_out = o_ref.shape[0]
    cdt = compute_dtype

    x = x_ref[...]                                           # (Ci8, W)

    # ---- conv1(relu(x)): im2col via halo scratch, single MXU matmul ----------
    # s1 has width W + 2P; interior [P, P+W) holds relu(x).  The P halo columns
    # on each side are never read for any lane that survives to the output
    # (valid lanes always index the interior), so they need no initialization.
    s1[:, P:P + W] = jnp.maximum(x, 0.0)
    a1 = jnp.concatenate([s1[:, j:j + W] for j in range(K)], axis=0)  # (K*Ci8, W)
    h1 = jnp.dot(w1_ref[...].astype(cdt), a1.astype(cdt),
                 preferred_element_type=jnp.float32) + b1_ref[...]    # (Co8, W)

    # Lanes that hold real (non-pad) samples inside each length-Lp segment.
    pos = jax.lax.broadcasted_iota(jnp.int32, (1, W), 1) % Lp
    valid = (pos >= P) & (pos < P + L)

    # ---- conv2(relu(h1)): masked so segment gaps act as conv2's zero padding --
    s2[:, P:P + W] = jnp.where(valid, jnp.maximum(h1, 0.0), 0.0)
    a2 = jnp.concatenate([s2[:, j:j + W] for j in range(K)], axis=0)  # (K*Co8, W)
    h2 = jnp.dot(w2_ref[...].astype(cdt), a2.astype(cdt),
                 preferred_element_type=jnp.float32) + b2_ref[...]    # (C_out, W)

    # ---- residual path --------------------------------------------------------
    if identity_res:
        res = x[:C_out]                                      # identity: just x
    else:
        res = jnp.dot(wr_ref[...].astype(cdt), x.astype(cdt),
                      preferred_element_type=jnp.float32) + br_ref[...]

    o_ref[...] = (h2 + res).astype(o_ref.dtype)              # lane-dense store


def _pick_block_batch(B, Lp, Ci8, Co8, K):
    # Target ~1024 lanes per grid step, bounded by a ~12 MiB activation budget.
    bt = max(1, min(B, max(1, 1024 // Lp)))
    per_col_bytes = 4 * (K + 5) * (Ci8 + Co8)
    bt = max(1, min(bt, (12 * 1024 * 1024) // max(1, per_col_bytes * Lp)))
    bt = min(bt, B)
    # Prefer >=2 grid steps (v7x has 2 TensorCores) if lanes stay >= 512 wide.
    if -(-B // bt) == 1 and bt > 1 and ((bt + 1) // 2) * Lp >= 512:
        bt = (bt + 1) // 2
    return bt


def double_conv_block(x, params, *, block_batch=None, compute_dtype=jnp.float32):
    """x: (B, C_in, L) float32.  params: PyTorch-layout conv weights/biases."""
    B, C_in, L = x.shape
    w1, b1 = params["w1"], params["b1"]        # (C_out, C_in, K), (C_out,)
    w2, b2 = params["w2"], params["b2"]        # (C_out, C_out, K), (C_out,)
    C_out, _, K = w1.shape
    assert K % 2 == 1, "only odd kernel sizes match PyTorch 'same' padding here"
    P = (K - 1) // 2
    identity_res = (C_in == C_out)             # PyTorch: nn.Identity() residual

    Ci8, Co8 = _rup(C_in, 8), _rup(C_out, 8)
    Lp = _rup(L + 2 * P, 128)                  # per-batch lane segment (128-dense)
    bt = block_batch or _pick_block_batch(B, Lp, Ci8, Co8, K)
    Bp = _rup(B, bt)
    W = bt * Lp

    # ---- glue (pure re-layout): concatenated, padded, channel-rounded inputs --
    xp = jnp.pad(x, ((0, Bp - B), (0, Ci8 - C_in), (P, Lp - L - P)))
    xc = jnp.transpose(xp, (1, 0, 2)).reshape(Ci8, Bp * Lp)           # (Ci8, Bp*Lp)

    w1m = jnp.pad(w1, ((0, Co8 - C_out), (0, Ci8 - C_in), (0, 0)))
    w1m = jnp.transpose(w1m, (0, 2, 1)).reshape(Co8, K * Ci8)         # (Co8, K*Ci8)
    b1m = jnp.pad(b1, (0, Co8 - C_out))[:, None]                      # (Co8, 1)
    w2m = jnp.pad(w2, ((0, 0), (0, Co8 - C_out), (0, 0)))
    w2m = jnp.transpose(w2m, (0, 2, 1)).reshape(C_out, K * Co8)       # (C_out, K*Co8)
    b2m = b2[:, None]                                                 # (C_out, 1)

    args = [xc, w1m, b1m, w2m, b2m]
    in_specs = [
        pl.BlockSpec((Ci8, W), lambda i: (0, i)),
        pl.BlockSpec((Co8, K * Ci8), lambda i: (0, 0)),
        pl.BlockSpec((Co8, 1), lambda i: (0, 0)),
        pl.BlockSpec((C_out, K * Co8), lambda i: (0, 0)),
        pl.BlockSpec((C_out, 1), lambda i: (0, 0)),
    ]
    if not identity_res:
        wrm = jnp.pad(params["wr"], ((0, 0), (0, Ci8 - C_in)))        # (C_out, Ci8)
        args += [wrm, params["br"][:, None]]
        in_specs += [pl.BlockSpec((C_out, Ci8), lambda i: (0, 0)),
                     pl.BlockSpec((C_out, 1), lambda i: (0, 0))]

    kernel = functools.partial(
        _double_conv_kernel, K=K, P=P, L=L, Lp=Lp,
        identity_res=identity_res, compute_dtype=compute_dtype)

    yc = pl.pallas_call(
        kernel,
        out_shape=jax.ShapeDtypeStruct((C_out, Bp * Lp), x.dtype),
        grid_spec=pltpu.PrefetchScalarGridSpec(
            num_scalar_prefetch=0,
            grid=(Bp // bt,),
            in_specs=in_specs,
            out_specs=pl.BlockSpec((C_out, W), lambda i: (0, i)),
            scratch_shapes=[
                pltpu.VMEM((Ci8, W + 2 * P), jnp.float32),
                pltpu.VMEM((Co8, W + 2 * P), jnp.float32),
            ]),
        compiler_params=pltpu.CompilerParams(
            dimension_semantics=("parallel",),
            vmem_limit_bytes=32 * 1024 * 1024),
    )(*args)

    # un-layout: (C_out, Bp*Lp) -> (B, C_out, L)
    y = yc.reshape(C_out, Bp, Lp)[:, :B, P:P + L]
    return jnp.transpose(y, (1, 0, 2))


# ----------------------------- pure-JAX reference ------------------------------
def _conv1d_ref(x, w, b, pad):
    out = jax.lax.conv_general_dilated(
        x, w, window_strides=(1,), padding=[(pad, pad)],
        dimension_numbers=("NCH", "OIH", "NCH"))
    return out + b[None, :, None]


def double_conv_block_ref(x, params):
    K = params["w1"].shape[-1]
    pad = (K - 1) // 2
    h = _conv1d_ref(jnp.maximum(x, 0.0), params["w1"], params["b1"], pad)
    h = _conv1d_ref(jnp.maximum(h, 0.0), params["w2"], params["b2"], pad)
    res = jnp.einsum("oc,bcl->bol", params["wr"], x) + params["br"][None, :, None]
    return h + res


def make_params(key, in_channels, out_channels, kernel):
    ks = jax.random.split(key, 6)
    scale1 = 1.0 / (in_channels * kernel) ** 0.5
    scale2 = 1.0 / (out_channels * kernel) ** 0.5
    scaler = 1.0 / in_channels ** 0.5
    w1 = jax.random.uniform(ks[0], (out_channels, in_channels, kernel),
                            jnp.float32, -scale1, scale1)
    b1 = jax.random.uniform(ks[1], (out_channels,), jnp.float32, -scale1, scale1)
    w2 = jax.random.uniform(ks[2], (out_channels, out_channels, kernel),
                            jnp.float32, -scale2, scale2)
    b2 = jax.random.uniform(ks[3], (out_channels,), jnp.float32, -scale2, scale2)
    if in_channels != out_channels:
        wr = jax.random.uniform(ks[4], (out_channels, in_channels),
                                jnp.float32, -scaler, scaler)
        br = jax.random.uniform(ks[5], (out_channels,), jnp.float32,
                                -scaler, scaler)
    else:
        # residual path is Identity -> identity 1x1 conv with zero bias (ref only)
        wr = jnp.eye(out_channels, dtype=jnp.float32)
        br = jnp.zeros((out_channels,), jnp.float32)
    return {"w1": w1, "b1": b1, "w2": w2, "b2": b2, "wr": wr, "br": br}


if __name__ == "__main__":
    # affine=False (Identity FiLM); residual = 1x1 conv since C_in != C_out
    B, C_in, C_out, L, K = 2, 4, 8, 16, 3
    key = jax.random.PRNGKey(0)
    kx, kp = jax.random.split(key)
    x = jax.random.normal(kx, (B, C_in, L), jnp.float32)
    params = make_params(kp, C_in, C_out, K)

    out = jax.block_until_ready(double_conv_block(x, params))
    ref = double_conv_block_ref(x, params)
    assert out.shape == (B, C_out, L)
    err = jnp.max(jnp.abs(out - ref))
    assert jnp.allclose(out, ref, atol=1e-4, rtol=1e-4), f"max err {err}"
    print("KERNEL_OK")
</pallas_src>

<mosaic_0001>
module attributes {stable_mosaic.version = 11 : i64} {
  func.func @_double_conv_kernel(%arg0: i32, %arg1: memref<8x256xf32, #tpu.memory_space<vmem>>, %arg2: memref<8x24xf32, #tpu.memory_space<vmem>>, %arg3: memref<8x1xf32, #tpu.memory_space<vmem>>, %arg4: memref<8x24xf32, #tpu.memory_space<vmem>>, %arg5: memref<8x1xf32, #tpu.memory_space<vmem>>, %arg6: memref<8x8xf32, #tpu.memory_space<vmem>>, %arg7: memref<8x1xf32, #tpu.memory_space<vmem>>, %arg8: memref<8x256xf32, #tpu.memory_space<vmem>>, %arg9: memref<8x258xf32, #tpu.memory_space<vmem>>, %arg10: memref<8x258xf32, #tpu.memory_space<vmem>>) attributes {dimension_semantics = [#tpu.dimension_semantics<parallel>], iteration_bounds = array<i64: 1>, scalar_prefetch = 0 : i64, scratch_operands = 2 : i64, tpu.core_type = #tpu.core_type<tc>, window_params = [{transform_indices = @transform_0, window_bounds = array<i64: 8, 256>}, {pipeline_mode = #tpu.pipeline_mode<synchronous>, transform_indices = @transform_1, window_bounds = array<i64: 8, 24>}, {pipeline_mode = #tpu.pipeline_mode<synchronous>, transform_indices = @transform_2, window_bounds = array<i64: 8, 1>}, {pipeline_mode = #tpu.pipeline_mode<synchronous>, transform_indices = @transform_3, window_bounds = array<i64: 8, 24>}, {pipeline_mode = #tpu.pipeline_mode<synchronous>, transform_indices = @transform_4, window_bounds = array<i64: 8, 1>}, {pipeline_mode = #tpu.pipeline_mode<synchronous>, transform_indices = @transform_5, window_bounds = array<i64: 8, 8>}, {pipeline_mode = #tpu.pipeline_mode<synchronous>, transform_indices = @transform_6, window_bounds = array<i64: 8, 1>}, {transform_indices = @transform_7, window_bounds = array<i64: 8, 256>}]} {
    %c0 = arith.constant 0 : index
    %c0_0 = arith.constant 0 : index
    %0 = vector.load %arg1[%c0, %c0_0] : memref<8x256xf32, #tpu.memory_space<vmem>>, vector<8x256xf32>
    %cst = arith.constant 0.000000e+00 : f32
    %1 = vector.broadcast %cst : f32 to vector<8x256xf32>
    %2 = arith.maximumf %0, %1 : vector<8x256xf32>
    %c0_1 = arith.constant 0 : index
    %c1 = arith.constant 1 : index
    %3 = vector.load %arg9[%c0_1, %c1] : memref<8x258xf32, #tpu.memory_space<vmem>>, vector<8x256xf32>
    tpu.vector_store %arg9[%c0_1, %c1], %2 {strides = array<i32>} : memref<8x258xf32, #tpu.memory_space<vmem>>, vector<8x256xf32>,
    %c0_2 = arith.constant 0 : index
    %c0_3 = arith.constant 0 : index
    %4 = vector.load %arg9[%c0_2, %c0_3] : memref<8x258xf32, #tpu.memory_space<vmem>>, vector<8x256xf32>
    %c0_4 = arith.constant 0 : index
    %c1_5 = arith.constant 1 : index
    %5 = vector.load %arg9[%c0_4, %c1_5] : memref<8x258xf32, #tpu.memory_space<vmem>>, vector<8x256xf32>
    %c0_6 = arith.constant 0 : index
    %c2 = arith.constant 2 : index
    %6 = vector.load %arg9[%c0_6, %c2] : memref<8x258xf32, #tpu.memory_space<vmem>>, vector<8x256xf32>
    %7 = tpu.concatenate %4, %5, %6 in 0 : vector<8x256xf32>, vector<8x256xf32>, vector<8x256xf32> -> vector<24x256xf32>
    %c0_7 = arith.constant 0 : index
    %c0_8 = arith.constant 0 : index
    %8 = vector.load %arg2[%c0_7, %c0_8] : memref<8x24xf32, #tpu.memory_space<vmem>>, vector<8x24xf32>
    %cst_9 = arith.constant dense<0.000000e+00> : vector<8x256xf32>
    %9 = tpu.matmul %8, %7, %cst_9 {dimension_numbers = #tpu.dot_dimension_numbers<[1], [0], [0], [1], [0, 0, 1, 1], [], []>} : vector<8x24xf32>, vector<24x256xf32>, vector<8x256xf32> -> vector<8x256xf32>
    %c0_10 = arith.constant 0 : index
    %c0_11 = arith.constant 0 : index
    %10 = vector.load %arg3[%c0_10, %c0_11] : memref<8x1xf32, #tpu.memory_space<vmem>>, vector<8x1xf32>
    %11 = vector.broadcast %10 : vector<8x1xf32> to vector<8x256xf32>
    %12 = arith.addf %9, %11 : vector<8x256xf32>
    %13 = tpu.iota {dimensions = array<i32: 1>} : vector<1x256xi32>
    %c128_i32 = arith.constant 128 : i32
    %c0_i32 = arith.constant 0 : i32
    %14 = arith.cmpi eq, %c128_i32, %c0_i32 : i32
    %c1_i32 = arith.constant 1 : i32
    %15 = arith.select %14, %c1_i32, %c128_i32 : i32
    %16 = vector.broadcast %15 : i32 to vector<1x256xi32>
    %17 = arith.remsi %13, %16 : vector<1x256xi32>
    %c0_i32_12 = arith.constant 0 : i32
    %18 = vector.broadcast %c0_i32_12 : i32 to vector<1x256xi32>
    %19 = arith.cmpi ne, %17, %18 : vector<1x256xi32>
    %c0_i32_13 = arith.constant 0 : i32
    %20 = vector.broadcast %c0_i32_13 : i32 to vector<1x256xi32>
    %21 = arith.cmpi slt, %17, %20 : vector<1x256xi32>
    %c0_i32_14 = arith.constant 0 : i32
    %22 = arith.cmpi slt, %15, %c0_i32_14 : i32
    %23 = vector.broadcast %22 : i1 to vector<1x256xi1>
    %24 = vector.broadcast %23 : vector<1x256xi1> to vector<1x256xi1>
    %25 = arith.xori %21, %24 : vector<1x256xi1>
    %26 = arith.andi %25, %19 : vector<1x256xi1>
    %27 = vector.broadcast %15 : i32 to vector<1x256xi32>
    %28 = arith.addi %17, %27 : vector<1x256xi32>
    %29 = arith.select %26, %28, %17 : vector<1x256xi1>, vector<1x256xi32>
    %c1_i32_15 = arith.constant 1 : i32
    %30 = vector.broadcast %c1_i32_15 : i32 to vector<1x256xi32>
    %31 = arith.cmpi sge, %29, %30 : vector<1x256xi32>
    %c17_i32 = arith.constant 17 : i32
    %32 = vector.broadcast %c17_i32 : i32 to vector<1x256xi32>
    %33 = arith.cmpi slt, %29, %32 : vector<1x256xi32>
    %34 = arith.andi %31, %33 : vector<1x256xi1>
    %cst_16 = arith.constant 0.000000e+00 : f32
    %35 = vector.broadcast %cst_16 : f32 to vector<8x256xf32>
    %36 = arith.maximumf %12, %35 : vector<8x256xf32>
    %cst_17 = arith.constant 0.000000e+00 : f32
    %37 = vector.shape_cast %34 : vector<1x256xi1> to vector<1x256xi1>
    %38 = vector.broadcast %37 : vector<1x256xi1> to vector<8x256xi1>
    %39 = vector.broadcast %cst_17 : f32 to vector<8x256xf32>
    %40 = arith.select %38, %36, %39 : vector<8x256xi1>, vector<8x256xf32>
    %c0_18 = arith.constant 0 : index
    %c1_19 = arith.constant 1 : index
    %41 = vector.load %arg10[%c0_18, %c1_19] : memref<8x258xf32, #tpu.memory_space<vmem>>, vector<8x256xf32>
    tpu.vector_store %arg10[%c0_18, %c1_19], %40 {strides = array<i32>} : memref<8x258xf32, #tpu.memory_space<vmem>>, vector<8x256xf32>,
    %c0_20 = arith.constant 0 : index
    %c0_21 = arith.constant 0 : index
    %42 = vector.load %arg10[%c0_20, %c0_21] : memref<8x258xf32, #tpu.memory_space<vmem>>, vector<8x256xf32>
    %c0_22 = arith.constant 0 : index
    %c1_23 = arith.constant 1 : index
    %43 = vector.load %arg10[%c0_22, %c1_23] : memref<8x258xf32, #tpu.memory_space<vmem>>, vector<8x256xf32>
    %c0_24 = arith.constant 0 : index
    %c2_25 = arith.constant 2 : index
    %44 = vector.load %arg10[%c0_24, %c2_25] : memref<8x258xf32, #tpu.memory_space<vmem>>, vector<8x256xf32>
    %45 = tpu.concatenate %42, %43, %44 in 0 : vector<8x256xf32>, vector<8x256xf32>, vector<8x256xf32> -> vector<24x256xf32>
    %c0_26 = arith.constant 0 : index
    %c0_27 = arith.constant 0 : index
    %46 = vector.load %arg4[%c0_26, %c0_27] : memref<8x24xf32, #tpu.memory_space<vmem>>, vector<8x24xf32>
    %cst_28 = arith.constant dense<0.000000e+00> : vector<8x256xf32>
    %47 = tpu.matmul %46, %45, %cst_28 {dimension_numbers = #tpu.dot_dimension_numbers<[1], [0], [0], [1], [0, 0, 1, 1], [], []>} : vector<8x24xf32>, vector<24x256xf32>, vector<8x256xf32> -> vector<8x256xf32>
    %c0_29 = arith.constant 0 : index
    %c0_30 = arith.constant 0 : index
    %48 = vector.load %arg5[%c0_29, %c0_30] : memref<8x1xf32, #tpu.memory_space<vmem>>, vector<8x1xf32>
    %49 = vector.broadcast %48 : vector<8x1xf32> to vector<8x256xf32>
    %50 = arith.addf %47, %49 : vector<8x256xf32>
    %c0_31 = arith.constant 0 : index
    %c0_32 = arith.constant 0 : index
    %51 = vector.load %arg6[%c0_31, %c0_32] : memref<8x8xf32, #tpu.memory_space<vmem>>, vector<8x8xf32>
    %cst_33 = arith.constant dense<0.000000e+00> : vector<8x256xf32>
    %52 = tpu.matmul %51, %0, %cst_33 {dimension_numbers = #tpu.dot_dimension_numbers<[1], [0], [0], [1], [0, 0, 1, 1], [], []>} : vector<8x8xf32>, vector<8x256xf32>, vector<8x256xf32> -> vector<8x256xf32>
    %c0_34 = arith.constant 0 : index
    %c0_35 = arith.constant 0 : index
    %53 = vector.load %arg7[%c0_34, %c0_35] : memref<8x1xf32, #tpu.memory_space<vmem>>, vector<8x1xf32>
    %54 = vector.broadcast %53 : vector<8x1xf32> to vector<8x256xf32>
    %55 = arith.addf %52, %54 : vector<8x256xf32>
    %56 = arith.addf %50, %55 : vector<8x256xf32>
    %c0_36 = arith.constant 0 : index
    %c0_37 = arith.constant 0 : index
    %57 = vector.load %arg8[%c0_36, %c0_37] : memref<8x256xf32, #tpu.memory_space<vmem>>, vector<8x256xf32>
    tpu.vector_store %arg8[%c0_36, %c0_37], %56 {strides = array<i32>} : memref<8x256xf32, #tpu.memory_space<vmem>>, vector<8x256xf32>,
    return
  }
  func.func @transform_0(%arg0: i32) -> (i32, i32) {
    %c0_i32 = arith.constant 0 : i32
    %c0_i32_0 = arith.constant 0 : i32
    return %c0_i32, %arg0 : i32, i32
  }
  func.func @transform_1(%arg0: i32) -> (i32, i32) {
    %c0_i32 = arith.constant 0 : i32
    %c0_i32_0 = arith.constant 0 : i32
    %c0_i32_1 = arith.constant 0 : i32
    return %c0_i32, %c0_i32_0 : i32, i32
  }
  func.func @transform_2(%arg0: i32) -> (i32, i32) {
    %c0_i32 = arith.constant 0 : i32
    %c0_i32_0 = arith.constant 0 : i32
    %c0_i32_1 = arith.constant 0 : i32
    return %c0_i32, %c0_i32_0 : i32, i32
  }
  func.func @transform_3(%arg0: i32) -> (i32, i32) {
    %c0_i32 = arith.constant 0 : i32
    %c0_i32_0 = arith.constant 0 : i32
    %c0_i32_1 = arith.constant 0 : i32
    return %c0_i32, %c0_i32_0 : i32, i32
  }
  func.func @transform_4(%arg0: i32) -> (i32, i32) {
    %c0_i32 = arith.constant 0 : i32
    %c0_i32_0 = arith.constant 0 : i32
    %c0_i32_1 = arith.constant 0 : i32
    return %c0_i32, %c0_i32_0 : i32, i32
  }
  func.func @transform_5(%arg0: i32) -> (i32, i32) {
    %c0_i32 = arith.constant 0 : i32
    %c0_i32_0 = arith.constant 0 : i32
    %c0_i32_1 = arith.constant 0 : i32
    return %c0_i32, %c0_i32_0 : i32, i32
  }
  func.func @transform_6(%arg0: i32) -> (i32, i32) {
    %c0_i32 = arith.constant 0 : i32
    %c0_i32_0 = arith.constant 0 : i32
    %c0_i32_1 = arith.constant 0 : i32
    return %c0_i32, %c0_i32_0 : i32, i32
  }
  func.func @transform_7(%arg0: i32) -> (i32, i32) {
    %c0_i32 = arith.constant 0 : i32
    %c0_i32_0 = arith.constant 0 : i32
    return %c0_i32, %arg0 : i32, i32
  }
}

</mosaic_0001>

<bundles_post_ra>
// kernel: tpu_custom_call.1
= control target key start
LH: loop header
LB: loop body
LE: loop exit
PB: predicated region body
PF: predicated region fallthrough
CT: control target
= control target key end

     0   :  { %12 = vsyncpa [#allocation5], 0  ;;  %s573_s0 = inlined_call_operand.vmem [shape: f32[8,256], index: 0, kind: input, shape index: {}]   ;;  %s574_s1 = inlined_call_operand.vmem [shape: f32[8,24], index: 1, kind: input, shape index: {}]   ;;  %s575_s2 = inlined_call_operand.vmem [shape: f32[8,1], index: 2, kind: input, shape index: {}]   ;;  %s576_s3 = inlined_call_operand.hbm [shape: f32[8,24], index: 3, kind: input, shape index: {}]   ;;  %s577_s4 = inlined_call_operand.vmem [shape: f32[8,1], index: 4, kind: input, shape index: {}]   ;;  %s578_s5 = inlined_call_operand.hbm [shape: f32[8,8], index: 5, kind: input, shape index: {}]   ;;  %s579_s6 = inlined_call_operand.vmem [shape: f32[8,1], index: 6, kind: input, shape index: {}]   ;;  %s580_s7 = inlined_call_operand.hbm [shape: f32[8,256], index: 7, kind: output, shape index: {}]  }
   0x1   :  { %13 = vsyncpa [#allocation8], 0 }
   0x2   :  { %14 = vsyncpa [#allocation6], 0  ;;  %s26_s26 = sshll.u32 %s576_s3, 4  ;;  %s469_s27 = smov [#allocation4]   ;;  %s27_s26 = int_to_ptr.hbm [resolvable:$true] %s26_s26 }
   0x3   :  { %s28_s28 = sshll.u32 %s469_s27, 4  ;;  %s39_s8 = sshll.u32 %s578_s5, 4  ;;  %s29_s28 = int_to_ptr.vmem [resolvable:$true] %s28_s28  ;;  %s40_s8 = int_to_ptr.hbm [resolvable:$true] %s39_s8 }
   0x4   :  { %31 = dma.hbm_to_vmem [thread:$0]  %s27_s26, 128, %s29_s28, [#allocation5]  }
   0x5   :  { %s470_s9 = smov [#allocation7]  }
   0x6   :  { %s41_s10 = sshll.u32 %s470_s9, 4  ;;  %s42_s10 = int_to_ptr.vmem [resolvable:$true] %s41_s10 }
   0x7   :  { %44 = dma.hbm_to_vmem [thread:$0]  %s40_s8, 128, %s42_s10, [#allocation8]  }
   0x8   :  { %463 = dma.done.wait [#allocation5], 128  }
   0x9   :  { %464 = vsyncadd [#allocation5], 4294967168 }
   0xa   :  { %465 = dma.done.wait [#allocation8], 128  }
   0xb   :  { %466 = vsyncadd [#allocation8], 4294967168  ;;  %v55_v0 = vld [vmem:[%s573_s0] sm:$0xff]  ;;  %s471_s12 = smov 1   ;;  %v56_v2 = vld [vmem:[%s573_s0 + $0x8] sm:$0xff]  ;;  %vm70_vm0 = vcmask 1047560   ;;  %v153_v25 = vlaneseq }
   0xc   :  { %v57_v1 = vmax.f32 %v55_v0, 0.0  ;;  %v58_v3 = vmax.f32 %v56_v2, 0.0  ;;  %vm65_vm1 = vcmask 7168   ;;  %s472_s14 = smov 127   ;;  %s473_s15 = smov 126   ;;  %v103_v10 = vld [vmem:[%s575_s2] sm:$0xff] }
   0xd   :  { %v474_v11 = vmov 0   ;;  %vm97_vm2 = vcmask 1031168   ;;  %vm86_vm3 = vcmask 1039360   ;;  %v102_v20 = vld [vmem:[%s574_s1] sm:$0xff]  ;;  %vm109_vm4 = vcmask 195584   ;;  %v283_v38 = vld [vmem:[#allocation7] sm:$0xff] }
   0xe   :  { %61 = vrot.lane.b32.xlu0 %v57_v1, %s471_s12  ;;  %390 = vset.pattern.permute.xlu2 %v474_v11  ;;  %v154_v26 = vand.u32 127, %v153_v25  ;;  %vm290_vm11 = vcmask 64512   ;;  %v284_v45 = vld [vmem:[%s579_s6] sm:$0xff]  ;;  %v233_v57 = vld [vmem:[#allocation4] sm:$0xff]  ;;  %s345_s23 = sshll.u32 %s580_s7, 4  ;;  %s346_s23 = int_to_ptr.hbm [resolvable:$true] %s345_s23 }
   0xf   :  { %379 = vset.pattern.permute.xlu0 %v474_v11  ;;  %v234_v46 = vld [vmem:[%s577_s4] sm:$0xff]  ;;  %s475_s4 = smov [#allocation9]  }
  0x10   :  { %v155_v27 = vadd.s32 128, %v154_v26  ;;  %vm180_vm5 = vcmp.ge.s32.totalorder %v154_v26, 1  ;;  %vm182_vm6 = vcmp.lt.s32.totalorder %v154_v26, 17  ;;  %s343_s6 = sshll.u32 %s475_s4, 4  ;;  %s344_s6 = int_to_ptr.vmem [resolvable:$true] %s343_s6 }
  0x11   :  { %vm184_vm7 = vmand %vm180_vm5, %vm182_vm6 }
  0x12   :  { %v167_v31 = vand.u32 127, %v155_v27 }
  0x14   :  { %vm181_vm8 = vcmp.ge.s32.totalorder %v167_v31, 1  ;;  %vm183_vm9 = vcmp.lt.s32.totalorder %v167_v31, 17 }
  0x15   :  { %vm185_vm10 = vmand %vm181_vm8, %vm183_vm9 }
  0x16   :  { %63 = vrot.lane.b32.xlu0 %v58_v3, %s471_s12 }
  0x1e   :  { %106 = vperm.xlu0 %379, %v103_v10  }
  0x80   :  { %v62_v4 = vpop.permute.xlu0 %61 }
  0x81   :  { %71 = vst.msk [vmem:[#allocation2] sm:$0xff] %vm70_vm0, %v62_v4 }
  0x88   :  { %v64_v5 = vpop.permute.xlu0 %63  ;;  %v74_v6 = vld [vmem:[#allocation2] sm:$0xff] }
  0x89   :  { %v66_v7 = vsel %vm65_vm1, %v62_v4, %v64_v5  ;;  %73 = vst.msk [vmem:[#allocation2 + $0x10] sm:$0xff] %vm65_vm1, %v64_v5 }
  0x8a   :  { %v374_v8 = vpack.i.bf16 %v66_v7, %v74_v6 }
  0x8c   :  { %375 = vrot.lane.b32.xlu2 %v374_v8, %s472_s14  ;;  %370 = vrot.lane.b32.xlu1 %v374_v8, %s473_s15 }
  0x90   :  { %v76_v9 = vld [vmem:[#allocation2 + $0x10] sm:$0xff]  ;;  %v107_v28 = vpop.permute.xlu0 %106 }
  0x94   :  { %84 = vrot.lane.b32.xlu2 %v76_v9, %s472_s14  ;;  %95 = vrot.lane.b32.xlu1 %v76_v9, %s473_s15 }
  0xe6   :  { %v376_v12 = vpop.permute.xlu2 %375 }
  0xe7   :  { %v378_v14 = vunpack.i.h.bf16 %v376_v12  ;;  %v377_v15 = vunpack.i.l.bf16 %v376_v12 }
  0xe9   :  { %v87_v19 = vsel %vm86_vm3, %v377_v15, %v378_v14 }
  0xee   :  { %v85_v21 = vpop.permute.xlu2 %84 }
  0xef   :  { %v88_v24 = vsel %vm86_vm3, %v378_v14, %v85_v21 }
  0xfe   :  { %v371_v13 = vpop.permute.xlu1 %370 }
  0xff   :  { %v373_v16 = vunpack.i.h.bf16 %v371_v13  ;;  %v372_v17 = vunpack.i.l.bf16 %v371_v13 }
 0x101   :  { %v98_v18 = vsel %vm97_vm2, %v372_v17, %v373_v16 }
 0x102   :  { %126 = vmatpush.msra.mxu0 %v98_v18 }
 0x104   :  { %127 = vmatpush.msra.mxu0 %v87_v19 }
 0x106   :  { %v96_v22 = vpop.permute.xlu1 %95  ;;  %128 = vmatpush.msra.mxu0 %v74_v6 }
 0x107   :  { %356 = vmatmul.msk.f32.vlgmr.msra.gmra.mxu0 %vm109_vm4, %v102_v20  ;;  %v99_v23 = vsel %vm97_vm2, %v373_v16, %v96_v22 }
 0x108   :  { %146 = vmatpush.msra.mxu1 %v99_v23  ;;  %309 = vmatpush.msrb.mxu0 %v55_v0 }
 0x10a   :  { %147 = vmatpush.msra.mxu1 %v88_v24 }
 0x10c   :  { %148 = vmatpush.msra.mxu1 %v66_v7 }
 0x10d   :  { %357 = vmatmul.msk.f32.vlgmr.msra.gmra.mxu1 %vm109_vm4, %v102_v20 }
 0x10e   :  { %329 = vmatpush.msrb.mxu1 %v56_v2 }
 0x10f   :  { %360 = vmatmul.msk.f32.vlgmr.msrb.gmra.mxu0 %vm290_vm11, %v283_v38 }
 0x115   :  { %361 = vmatmul.msk.f32.vlgmr.msrb.gmra.mxu1 %vm290_vm11, %v283_v38 }
 0x184   :  { %v130_v29 = vpop.f32.mrf.mxu0 }
 0x185   :  { %v131_v30 = vadd.f32 %v130_v29, %v107_v28 }
 0x187   :  { %v186_v32 = vmax.f32 %v131_v30, 0.0 }
 0x189   :  { %v192_v33 = vsel %vm184_vm7, %v186_v32, 0.0 }
 0x18a   :  { %v150_v34 = vpop.f32.mrf.mxu1  ;;  %196 = vrot.lane.b32.xlu1 %v192_v33, %s471_s12 }
 0x18b   :  { %v151_v35 = vadd.f32 %v150_v34, %v107_v28 }
 0x18c   :  { %v311_v60 = vpop.f32.mrf.mxu0 }
 0x18d   :  { %v187_v36 = vmax.f32 %v151_v35, 0.0 }
 0x18f   :  { %v193_v37 = vsel %vm185_vm10, %v187_v36, 0.0 }
 0x190   :  { %198 = vrot.lane.b32.xlu2 %v193_v37, %s471_s12 }
 0x192   :  { %v331_v2 = vpop.f32.mrf.mxu1 }
 0x1ea   :  { %v199_v39 = vpop.permute.xlu2 %198 }
 0x1eb   :  { %206 = vst.msk [vmem:[#allocation3 + $0x10] sm:$0xff] %vm65_vm1, %v199_v39 }
 0x1f2   :  { %v209_v40 = vld [vmem:[#allocation3 + $0x10] sm:$0xff] }
 0x1f3   :  { %227 = vrot.lane.b32.xlu2 %v209_v40, %s473_s15 }
 0x1fb   :  { %237 = vperm.xlu2 %390, %v234_v46  }
 0x1fc   :  { %v197_v41 = vpop.permute.xlu1 %196 }
 0x1fd   :  { %v200_v42 = vsel %vm65_vm1, %v197_v41, %v199_v39  ;;  %204 = vst.msk [vmem:[#allocation3] sm:$0xff] %vm70_vm0, %v197_v41 }
 0x204   :  { %v207_v43 = vld [vmem:[#allocation3] sm:$0xff] }
 0x205   :  { %v385_v44 = vpack.i.bf16 %v200_v42, %v207_v43 }
 0x207   :  { %386 = vrot.lane.b32.xlu0 %v385_v44, %s472_s14  ;;  %381 = vrot.lane.b32.xlu1 %v385_v44, %s473_s15 }
 0x20f   :  { %287 = vperm.xlu0 %379, %v284_v45   ;;  %217 = vrot.lane.b32.xlu1 %v209_v40, %s472_s14 }
 0x24d   :  { %v228_v53 = vpop.permute.xlu2 %227 }
 0x255   :  { %v238_v62 = vpop.permute.xlu2 %237 }
 0x279   :  { %v387_v47 = vpop.permute.xlu0 %386  ;;  %v382_v48 = vpop.permute.xlu1 %381 }
 0x27a   :  { %v389_v49 = vunpack.i.h.bf16 %v387_v47  ;;  %v388_v50 = vunpack.i.l.bf16 %v387_v47  ;;  %v384_v51 = vunpack.i.h.bf16 %v382_v48  ;;  %v383_v52 = vunpack.i.l.bf16 %v382_v48 }
 0x27c   :  { %v229_v54 = vsel %vm97_vm2, %v383_v52, %v384_v51  ;;  %v230_v55 = vsel %vm97_vm2, %v384_v51, %v228_v53  ;;  %v219_v56 = vsel %vm86_vm3, %v388_v50, %v389_v49 }
 0x27d   :  { %256 = vmatpush.msra.mxu2 %v229_v54  ;;  %276 = vmatpush.msra.mxu3 %v230_v55 }
 0x27f   :  { %257 = vmatpush.msra.mxu2 %v219_v56 }
 0x281   :  { %v218_v58 = vpop.permute.xlu1 %217  ;;  %258 = vmatpush.msra.mxu2 %v207_v43  ;;  %v288_v61 = vpop.permute.xlu0 %287 }
 0x282   :  { %358 = vmatmul.msk.f32.vlgmr.msra.gmra.mxu2 %vm109_vm4, %v233_v57  ;;  %v220_v59 = vsel %vm86_vm3, %v389_v49, %v218_v58  ;;  %v312_v0 = vadd.f32 %v311_v60, %v288_v61  ;;  %v332_v5 = vadd.f32 %v331_v2, %v288_v61 }
 0x283   :  { %277 = vmatpush.msra.mxu3 %v220_v59 }
 0x285   :  { %278 = vmatpush.msra.mxu3 %v200_v42 }
 0x286   :  { %359 = vmatmul.msk.f32.vlgmr.msra.gmra.mxu3 %vm109_vm4, %v233_v57 }
 0x305   :  { %v260_v63 = vpop.f32.mrf.mxu2 }
 0x306   :  { %v261_v1 = vadd.f32 %v260_v63, %v238_v62 }
 0x308   :  { %v334_v3 = vadd.f32 %v312_v0, %v261_v1 }
 0x309   :  { %v280_v4 = vpop.f32.mrf.mxu3 }
 0x30a   :  { %336 = vst [vmem:[#allocation9] sm:$0xff] %v334_v3  ;;  %v281_v6 = vadd.f32 %v280_v4, %v238_v62 }
 0x30c   :  { %v335_v7 = vadd.f32 %v332_v5, %v281_v6 }
 0x30e   :  { %337 = vst [vmem:[#allocation9 + $0x8] sm:$0xff] %v335_v7 }
 0x30f   :  { %348 = dma.vmem_to_hbm [thread:$0]  %s344_s6, 256, %s346_s23, [#allocation6]  }
 0x310   :  { %467 = dma.done.wait [#allocation6], 256  }
 0x311   :  { %468 = vsyncadd [#allocation6], 4294967040 }
 0x312   :  { %353 = vsyncpa [#allocation5], 1 }
 0x313   :  { %354 = vsyncpa [#allocation8], 1 }
 0x314   :  { %355 = vsyncpa [#allocation6], 1 }

</bundles_post_ra>
